<compile_context>
chip_gen: v7x
topology: tpu7x:2x2x1
jax: 0.10.0
libtpu: 0.0.40
codegen_flags: <defaults>
</compile_context>

<pallas_src>
import math

import jax
import jax.numpy as jnp
from jax.experimental import pallas as pl
from jax.experimental.pallas import tpu as pltpu


def _round_up(x, m):
    return (x + m - 1) // m * m


def critic_kernel(state_ref, action_ref,
                  w1_ref, b1_ref,
                  w2_ref, wa_ref, b2a_ref,
                  wq_ref, bq_ref,
                  q_ref):
    # state_ref  : (B, input_dim)   bf16
    # action_ref : (B, act_k)       bf16  (zero-padded to a multiple of 16)
    # w1_ref     : (input_dim, FC1) bf16
    # b1_ref     : (1, FC1)         f32
    # w2_ref     : (FC1, FC2)       bf16
    # wa_ref     : (act_k, FC2)     bf16  (rows = [Wa ; small zero-pad])
    # b2a_ref    : (1, FC2)         f32   (= b2 + ba, pre-summed)
    # wq_ref     : (1, FC2)         f32   q-head weight as a row vector
    # bq_ref     : (1,)             f32   in SMEM
    # q_ref      : (B, 1)           f32

    # fc1: bf16 MXU matmul, f32 accumulate; bias + relu in f32 on the VPU.
    sv = jnp.dot(state_ref[...], w1_ref[...], preferred_element_type=jnp.float32)
    sv = jnp.maximum(sv + b1_ref[...], 0.0)

    # action_value: tiny bf16 MXU matmul (K = act_k), f32 accumulate.
    av = jnp.dot(action_ref[...], wa_ref[...], preferred_element_type=jnp.float32)

    # fc2 on the relu'd state value; add action value + pre-summed bias, relu.
    h = jnp.dot(sv.astype(jnp.bfloat16), w2_ref[...],
                preferred_element_type=jnp.float32)
    sav = jnp.maximum(h + av + b2a_ref[...], 0.0)

    # q head (N=1): VPU multiply + lane reduce; scalar bias from SMEM.
    q = jnp.sum(sav * wq_ref[...], axis=-1, keepdims=True) + bq_ref[0]
    q_ref[...] = q.astype(q_ref.dtype)


def pack_params(params):
    """One-time (per weight update) packing: bf16 weight casts, pre-summed
    fc2/action bias, small sublane-friendly Wa pad, q head as row + scalar.
    Keep the result cached in the training step; do NOT re-pack per forward."""
    n_actions = params["wa"].shape[0]
    act_k = _round_up(max(n_actions, 1), 16)   # bf16 sublane packing = 16
    return dict(
        w1=params["w1"].astype(jnp.bfloat16),
        b1=params["b1"].astype(jnp.float32),
        w2=params["w2"].astype(jnp.bfloat16),
        wa=jnp.pad(params["wa"],
                   ((0, act_k - n_actions), (0, 0))).astype(jnp.bfloat16),
        b2a=(params["b2"] + params["ba"]).astype(jnp.float32),
        wq=params["wq"].reshape(1, -1).astype(jnp.float32),
        bq=params["bq"].reshape(1).astype(jnp.float32),
    )


def critic_forward(state, action, packed):
    """Single-block kernel: whole problem fits comfortably in VMEM at these sizes."""
    B = state.shape[0]
    n_actions = action.shape[1]
    act_k, fc2 = packed["wa"].shape
    in_dim, fc1 = packed["w1"].shape

    # Per-call activation casts only (weights are already packed).
    state_bf = state.astype(jnp.bfloat16)
    action_bf = jnp.pad(action, ((0, 0), (0, act_k - n_actions))).astype(jnp.bfloat16)

    vmem = pl.BlockSpec(memory_space=pltpu.MemorySpace.VMEM)
    smem = pl.BlockSpec(memory_space=pltpu.MemorySpace.SMEM)

    flops = 2 * B * (in_dim * fc1 + fc1 * fc2 + act_k * fc2 + fc2)
    bytes_accessed = (
        2 * (state_bf.size + action_bf.size
             + packed["w1"].size + packed["w2"].size + packed["wa"].size)
        + 4 * (packed["b1"].size + packed["b2a"].size
               + packed["wq"].size + packed["bq"].size)
        + 4 * B)

    return pl.pallas_call(
        critic_kernel,
        out_shape=jax.ShapeDtypeStruct((B, 1), jnp.float32),
        in_specs=[vmem, vmem, vmem, vmem, vmem, vmem, vmem, vmem, smem],
        out_specs=vmem,
        cost_estimate=pl.CostEstimate(flops=flops, transcendentals=0,
                                      bytes_accessed=bytes_accessed),
    )(state_bf, action_bf,
      packed["w1"], packed["b1"],
      packed["w2"], packed["wa"], packed["b2a"],
      packed["wq"], packed["bq"])


def init_linear(key, fan_in, fan_out):
    """Mimics PyTorch nn.Linear default init U[-1/sqrt(fan_in), 1/sqrt(fan_in)].
    Weight returned already transposed to (fan_in, fan_out); bias as (1, fan_out)."""
    kw, kb = jax.random.split(key)
    bound = 1.0 / math.sqrt(fan_in)
    w = jax.random.uniform(kw, (fan_in, fan_out), jnp.float32, -bound, bound)
    b = jax.random.uniform(kb, (1, fan_out), jnp.float32, -bound, bound)
    return w, b


def critic_reference(state, action, p):
    """Unfused reference mirroring the kernel's mixed precision
    (bf16 matmul operands, f32 accumulation/elementwise)."""
    bf = lambda x: x.astype(jnp.bfloat16).astype(jnp.float32)
    sv = jax.nn.relu(bf(state) @ bf(p["w1"]) + p["b1"])
    sv2 = bf(sv) @ bf(p["w2"]) + p["b2"]
    av = bf(action) @ bf(p["wa"]) + p["ba"]
    sav = jax.nn.relu(sv2 + av)
    return sav @ p["wq"] + p["bq"]


# TODO(synk): Adam optimizer (weight_decay=0.01) and checkpoint save/load from the
# PyTorch module are training/IO machinery, not part of the forward pass; omitted.

if __name__ == "__main__":
    # Shapes consistent with the module: input_dims=(32,), n_actions=8,
    # fc1_dims=fc2_dims=256 (PyTorch defaults), batch=8 (minimum f32 tile height).
    B, INPUT_DIM, N_ACTIONS, FC1, FC2 = 8, 32, 8, 256, 256

    key = jax.random.PRNGKey(0)
    k_state, k_action, k1, k2, k3, k4 = jax.random.split(key, 6)

    state = jax.random.normal(k_state, (B, INPUT_DIM), jnp.float32)
    action = jax.random.normal(k_action, (B, N_ACTIONS), jnp.float32)

    w1, b1 = init_linear(k1, INPUT_DIM, FC1)     # self.fc1
    w2, b2 = init_linear(k2, FC1, FC2)           # self.fc2
    wa, ba = init_linear(k3, N_ACTIONS, FC2)     # self.action_value
    wq, bq = init_linear(k4, FC2, 1)             # self.q

    params = dict(w1=w1, b1=b1, w2=w2, b2=b2, wa=wa, ba=ba, wq=wq, bq=bq)

    # Pack weights ONCE (outside the per-step path); reuse across forwards.
    packed = jax.block_until_ready(pack_params(params))

    fwd = jax.jit(critic_forward)
    q = fwd(state, action, packed)
    q = jax.block_until_ready(q)

    q_ref = critic_reference(state, action, params)
    assert q.shape == (B, 1), q.shape
    assert jnp.allclose(q, q_ref, atol=2e-3, rtol=2e-3), "mismatch vs JAX reference"

    print("KERNEL_OK")
</pallas_src>

<mosaic_0001>
module attributes {stable_mosaic.version = 11 : i64} {
  func.func @critic_kernel(%arg0: memref<8x32xbf16, #tpu.memory_space<vmem>>, %arg1: memref<8x16xbf16, #tpu.memory_space<vmem>>, %arg2: memref<32x256xbf16, #tpu.memory_space<vmem>>, %arg3: memref<1x256xf32, #tpu.memory_space<vmem>>, %arg4: memref<256x256xbf16, #tpu.memory_space<vmem>>, %arg5: memref<16x256xbf16, #tpu.memory_space<vmem>>, %arg6: memref<1x256xf32, #tpu.memory_space<vmem>>, %arg7: memref<1x256xf32, #tpu.memory_space<vmem>>, %arg8: memref<1xf32, #tpu.memory_space<smem>>, %arg9: memref<8x1xf32, #tpu.memory_space<vmem>>) attributes {dimension_semantics = [], scalar_prefetch = 0 : i64, scratch_operands = 0 : i64, tpu.core_type = #tpu.core_type<tc>} {
    %c0 = arith.constant 0 : index
    %c0_0 = arith.constant 0 : index
    %0 = vector.load %arg0[%c0, %c0_0] : memref<8x32xbf16, #tpu.memory_space<vmem>>, vector<8x32xbf16>
    %c0_1 = arith.constant 0 : index
    %c0_2 = arith.constant 0 : index
    %1 = vector.load %arg2[%c0_1, %c0_2] : memref<32x256xbf16, #tpu.memory_space<vmem>>, vector<32x256xbf16>
    %cst = arith.constant dense<0.000000e+00> : vector<8x256xf32>
    %2 = tpu.matmul %0, %1, %cst {dimension_numbers = #tpu.dot_dimension_numbers<[1], [0], [0], [1], [0, 0, 1, 1], [], []>} : vector<8x32xbf16>, vector<32x256xbf16>, vector<8x256xf32> -> vector<8x256xf32>
    %c0_3 = arith.constant 0 : index
    %c0_4 = arith.constant 0 : index
    %3 = vector.load %arg3[%c0_3, %c0_4] : memref<1x256xf32, #tpu.memory_space<vmem>>, vector<1x256xf32>
    %4 = vector.broadcast %3 : vector<1x256xf32> to vector<8x256xf32>
    %5 = arith.addf %2, %4 : vector<8x256xf32>
    %cst_5 = arith.constant 0.000000e+00 : f32
    %6 = vector.broadcast %cst_5 : f32 to vector<8x256xf32>
    %7 = arith.maximumf %5, %6 : vector<8x256xf32>
    %c0_6 = arith.constant 0 : index
    %c0_7 = arith.constant 0 : index
    %8 = vector.load %arg1[%c0_6, %c0_7] : memref<8x16xbf16, #tpu.memory_space<vmem>>, vector<8x16xbf16>
    %c0_8 = arith.constant 0 : index
    %c0_9 = arith.constant 0 : index
    %9 = vector.load %arg5[%c0_8, %c0_9] : memref<16x256xbf16, #tpu.memory_space<vmem>>, vector<16x256xbf16>
    %cst_10 = arith.constant dense<0.000000e+00> : vector<8x256xf32>
    %10 = tpu.matmul %8, %9, %cst_10 {dimension_numbers = #tpu.dot_dimension_numbers<[1], [0], [0], [1], [0, 0, 1, 1], [], []>} : vector<8x16xbf16>, vector<16x256xbf16>, vector<8x256xf32> -> vector<8x256xf32>
    %11 = arith.truncf %7 : vector<8x256xf32> to vector<8x256xbf16>
    %c0_11 = arith.constant 0 : index
    %c0_12 = arith.constant 0 : index
    %12 = vector.load %arg4[%c0_11, %c0_12] : memref<256x256xbf16, #tpu.memory_space<vmem>>, vector<256x256xbf16>
    %cst_13 = arith.constant dense<0.000000e+00> : vector<8x256xf32>
    %13 = tpu.matmul %11, %12, %cst_13 {dimension_numbers = #tpu.dot_dimension_numbers<[1], [0], [0], [1], [0, 0, 1, 1], [], []>} : vector<8x256xbf16>, vector<256x256xbf16>, vector<8x256xf32> -> vector<8x256xf32>
    %14 = arith.addf %13, %10 : vector<8x256xf32>
    %c0_14 = arith.constant 0 : index
    %c0_15 = arith.constant 0 : index
    %15 = vector.load %arg6[%c0_14, %c0_15] : memref<1x256xf32, #tpu.memory_space<vmem>>, vector<1x256xf32>
    %16 = vector.broadcast %15 : vector<1x256xf32> to vector<8x256xf32>
    %17 = arith.addf %14, %16 : vector<8x256xf32>
    %cst_16 = arith.constant 0.000000e+00 : f32
    %18 = vector.broadcast %cst_16 : f32 to vector<8x256xf32>
    %19 = arith.maximumf %17, %18 : vector<8x256xf32>
    %c0_17 = arith.constant 0 : index
    %c0_18 = arith.constant 0 : index
    %20 = vector.load %arg7[%c0_17, %c0_18] : memref<1x256xf32, #tpu.memory_space<vmem>>, vector<1x256xf32>
    %21 = vector.broadcast %20 : vector<1x256xf32> to vector<8x256xf32>
    %22 = arith.mulf %19, %21 : vector<8x256xf32>
    %cst_19 = arith.constant dense<0.000000e+00> : vector<8xf32>
    %23 = vector.multi_reduction <add>, %22, %cst_19 [1] : vector<8x256xf32> to vector<8xf32>
    %24 = vector.shape_cast %23 : vector<8xf32> to vector<8x1xf32>
    %c0_20 = arith.constant 0 : index
    %25 = memref.load %arg8[%c0_20] : memref<1xf32, #tpu.memory_space<smem>>
    %26 = vector.broadcast %25 : f32 to vector<8x1xf32>
    %27 = arith.addf %24, %26 : vector<8x1xf32>
    %c0_21 = arith.constant 0 : index
    %c0_22 = arith.constant 0 : index
    %28 = vector.load %arg9[%c0_21, %c0_22] : memref<8x1xf32, #tpu.memory_space<vmem>>, vector<8x1xf32>
    tpu.vector_store %arg9[%c0_21, %c0_22], %27 {strides = array<i32>} : memref<8x1xf32, #tpu.memory_space<vmem>>, vector<8x1xf32>,
    return
  }
}

</mosaic_0001>

<bundles_post_ra>
// kernel: critic_forward.1
= control target key start
LH: loop header
LB: loop body
LE: loop exit
PB: predicated region body
PF: predicated region fallthrough
CT: control target
= control target key end

     0   :  { %15 = vsyncpa [#allocation4], 0  ;;  %s746_s0 = inlined_call_operand.vmem [shape: bf16[8,32], index: 0, kind: input, shape index: {}]   ;;  %s747_s1 = inlined_call_operand.vmem [shape: bf16[8,16], index: 1, kind: input, shape index: {}]   ;;  %s748_s2 = inlined_call_operand.vmem [shape: bf16[32,256], index: 2, kind: input, shape index: {}]   ;;  %s749_s3 = inlined_call_operand.vmem [shape: f32[1,256], index: 3, kind: input, shape index: {}]   ;;  %s750_s4 = inlined_call_operand.hbm [shape: bf16[256,256], index: 4, kind: input, shape index: {}]   ;;  %s751_s5 = inlined_call_operand.vmem [shape: bf16[16,256], index: 5, kind: input, shape index: {}]   ;;  %s752_s6 = inlined_call_operand.hbm [shape: f32[1,256], index: 6, kind: input, shape index: {}]   ;;  %s753_s7 = inlined_call_operand.vmem [shape: f32[1,256], index: 7, kind: input, shape index: {}]   ;;  %s754_s8 = inlined_call_operand.<no memory space> [shape: f32[1], index: 8, kind: input, shape index: {}]   ;;  %s755_s9 = inlined_call_operand.vmem [shape: f32[8,1], index: 9, kind: output, shape index: {}]  }
   0x1   :  { %16 = vsyncpa [#allocation6], 0  ;;  %s631_s30 = smov [#allocation3]   ;;  %s583_s13 = scalar_lea.hbm %s750_s4, 4096 }
   0x2   :  { %s30_s10 = sshll.u32 %s631_s30, 4  ;;  %p584_p0 = scmp.ne.s32.totalorder %s750_s4, %s583_s13  ;;  %s31_s10 = int_to_ptr.vmem [resolvable:$true] %s30_s10 }
   0x3   :  { %p587_p1 = scmp.lt.u32.totalorder %s583_s13, %s750_s4 }
   0x5   :  { %p589_p2 = pnand %p587_p1, %p584_p0 }
   0x7   :  { %592 = shalt.err (!%p589_p2)
}
   0x8   :  { %s593_s18 = scalar_lea.vmem %s31_s10, 4096  ;;  %p598_p4 = scmp.lt.s32.totalorder %s31_s10, %s31_s10 }
   0x9   :  { %p594_p3 = scmp.ne.s32.totalorder %s31_s10, %s593_s18  ;;  %p599_p5 = scmp.lt.s32.totalorder %s593_s18, %s593_s18 }
   0xb   :  { %p600_p6 = por %p599_p5, %p598_p4 }
   0xd   :  { %p601_p7 = pnand %p600_p6, %p594_p3 }
   0xf   :  { %604 = shalt.err (!%p601_p7)
}
  0x10   :  { %s632_s19 = smov 128   ;;  %s633_s20 = smov 8  }
  0x11   :  { %36 = dma.hbm_to_vmem [thread:$0]  %s750_s4, 4096, %s31_s10, [#allocation4], %s632_s19, %s632_s19, %s633_s20  }
  0x12   :  { %s634_s23 = smov [#allocation5]   ;;  %s605_s27 = scalar_lea.hbm %s752_s6, 32 }
  0x13   :  { %s45_s24 = sshll.u32 %s634_s23, 4  ;;  %p606_p8 = scmp.ne.s32.totalorder %s752_s6, %s605_s27  ;;  %s46_s24 = int_to_ptr.vmem [resolvable:$true] %s45_s24 }
  0x14   :  { %p609_p9 = scmp.lt.u32.totalorder %s605_s27, %s752_s6 }
  0x16   :  { %p611_p10 = pnand %p609_p9, %p606_p8 }
  0x18   :  { %614 = shalt.err (!%p611_p10)
}
  0x19   :  { %s615_s12 = scalar_lea.vmem %s46_s24, 32  ;;  %p620_p12 = scmp.lt.s32.totalorder %s46_s24, %s46_s24 }
  0x1a   :  { %p616_p11 = scmp.ne.s32.totalorder %s46_s24, %s615_s12  ;;  %p621_p13 = scmp.lt.s32.totalorder %s615_s12, %s615_s12 }
  0x1c   :  { %p622_p0 = por %p621_p13, %p620_p12 }
  0x1e   :  { %p623_p1 = pnand %p622_p0, %p616_p11 }
  0x20   :  { %626 = shalt.err (!%p623_p1)
}
  0x21   :  { %48 = dma.hbm_to_vmem [thread:$0]  %s752_s6, 32, %s46_s24, [#allocation6]  }
  0x22   :  { %627 = dma.done.wait [#allocation4], 4096  }
  0x23   :  { %628 = vsyncadd [#allocation4], 4294963200 }
  0x24   :  { %629 = dma.done.wait [#allocation6], 32  }
  0x25   :  { %630 = vsyncadd [#allocation6], 4294967264  ;;  %v635_v0 = vmov 0   ;;  %v526_v1 = vld [vmem:[%s748_s2 + $0x4] ss:$8 sps:$4 sm:$0xff]   ;;  %vm97_vm0 = vcmask 261120   ;;  %v67_v41 = vlaneseq }
  0x26   :  { %133 = vmatprep.mubr.bf16.mxu0 %v635_v0  ;;  %v528_v2 = vld [vmem:[%s748_s2] ss:$8 sps:$4 sm:$0xff]   ;;  %101 = vmatprep.subr.bf16.mxu0 %v526_v1  ;;  %v529_v3 = vld [vmem:[%s748_s2 + $0x14] ss:$8 sps:$4 sm:$0xff]   ;;  %v531_v4 = vld [vmem:[%s748_s2 + $0x10] ss:$8 sps:$4 sm:$0xff]  }
  0x27   :  { %102 = vmatpush1.bf16.msra.mxu0 %v528_v2  ;;  %v532_v5 = vld [vmem:[#allocation3 + $0x4] ss:$8 sps:$4 sm:$0xff]   ;;  %v534_v6 = vld [vmem:[#allocation3] ss:$8 sps:$4 sm:$0xff]   ;;  %v535_v7 = vld [vmem:[#allocation3 + $0x14] ss:$8 sps:$4 sm:$0xff]  }
  0x28   :  { %103 = vmatprep.subr.bf16.mxu0 %v529_v3  ;;  %396 = vmatprep.subr.bf16.mxu1 %v532_v5  ;;  %v60_v8 = vld [vmem:[%s746_s0] sm:$0xf]  ;;  %v537_v9 = vld [vmem:[#allocation3 + $0x10] ss:$8 sps:$4 sm:$0xff]   ;;  %v538_v10 = vld [vmem:[#allocation3 + $0x24] ss:$8 sps:$4 sm:$0xff]  }
  0x29   :  { %397 = vmatpush1.bf16.msra.mxu1 %v534_v6  ;;  %v540_v11 = vld [vmem:[#allocation3 + $0x20] ss:$8 sps:$4 sm:$0xff]   ;;  %v541_v12 = vld [vmem:[#allocation3 + $0x34] ss:$8 sps:$4 sm:$0xff]   ;;  %v543_v13 = vld [vmem:[#allocation3 + $0x30] ss:$8 sps:$4 sm:$0xff]  }
  0x2a   :  { %398 = vmatprep.subr.bf16.mxu1 %v535_v7  ;;  %v544_v14 = vld [vmem:[#allocation3 + $0x44] ss:$8 sps:$4 sm:$0xff]   ;;  %v546_v15 = vld [vmem:[#allocation3 + $0x40] ss:$8 sps:$4 sm:$0xff]   ;;  %v547_v16 = vld [vmem:[#allocation3 + $0x54] ss:$8 sps:$4 sm:$0xff]  }
  0x2b   :  { %104 = vmatpush1.bf16.msra.mxu0 %v531_v4  ;;  %v549_v17 = vld [vmem:[#allocation3 + $0x50] ss:$8 sps:$4 sm:$0xff]   ;;  %v550_v18 = vld [vmem:[#allocation3 + $0x64] ss:$8 sps:$4 sm:$0xff]   ;;  %v552_v19 = vld [vmem:[#allocation3 + $0x60] ss:$8 sps:$4 sm:$0xff]  }
  0x2c   :  { %v553_v20 = vld [vmem:[#allocation3 + $0x74] ss:$8 sps:$4 sm:$0xff]   ;;  %v555_v21 = vld [vmem:[#allocation3 + $0x70] ss:$8 sps:$4 sm:$0xff]   ;;  %v556_v22 = vld [vmem:[#allocation3 + $0x84] ss:$8 sps:$4 sm:$0xff]  }
  0x2d   :  { %399 = vmatpush1.bf16.msra.mxu1 %v537_v9  ;;  %v558_v23 = vld [vmem:[#allocation3 + $0x80] ss:$8 sps:$4 sm:$0xff]   ;;  %v559_v24 = vld [vmem:[#allocation3 + $0x94] ss:$8 sps:$4 sm:$0xff]   ;;  %v561_v25 = vld [vmem:[#allocation3 + $0x90] ss:$8 sps:$4 sm:$0xff]  }
  0x2e   :  { %485 = vmatmul.mubr.msk.bf16.vlgmr.msra.gmra.mrb[0].mxu0 %vm97_vm0, %v60_v8  ;;  %400 = vmatprep.subr.bf16.mxu1 %v538_v10  ;;  %v562_v26 = vld [vmem:[#allocation3 + $0xa4] ss:$8 sps:$4 sm:$0xff]   ;;  %v564_v27 = vld [vmem:[#allocation3 + $0xa0] ss:$8 sps:$4 sm:$0xff]   ;;  %v565_v28 = vld [vmem:[#allocation3 + $0xb4] ss:$8 sps:$4 sm:$0xff]  }
  0x2f   :  { %193 = vmatprep.mubr.bf16.mxu0 %v635_v0  ;;  %v567_v29 = vld [vmem:[#allocation3 + $0xb0] ss:$8 sps:$4 sm:$0xff]   ;;  %v568_v30 = vld [vmem:[#allocation3 + $0xc4] ss:$8 sps:$4 sm:$0xff]   ;;  %v570_v31 = vld [vmem:[#allocation3 + $0xc0] ss:$8 sps:$4 sm:$0xff]  }
  0x30   :  { %v571_v32 = vld [vmem:[#allocation3 + $0xd4] ss:$8 sps:$4 sm:$0xff]   ;;  %v573_v33 = vld [vmem:[#allocation3 + $0xd0] ss:$8 sps:$4 sm:$0xff]   ;;  %v577_v34 = vld [vmem:[#allocation3 + $0xe4] ss:$8 sps:$4 sm:$0xff]  }
  0x31   :  { %401 = vmatpush1.bf16.msra.mxu1 %v540_v11  ;;  %v576_v35 = vld [vmem:[%s751_s5 + $0x4] ss:$8 sps:$4 sm:$0xff]   ;;  %v579_v36 = vld [vmem:[#allocation3 + $0xe0] ss:$8 sps:$4 sm:$0xff]   ;;  %v580_v38 = vld [vmem:[#allocation3 + $0xf4] ss:$8 sps:$4 sm:$0xff]  }
  0x32   :  { %402 = vmatprep.subr.bf16.mxu1 %v541_v12  ;;  %v574_v37 = vld [vmem:[%s751_s5] ss:$8 sps:$4 sm:$0xff]   ;;  %161 = vmatprep.subr.bf16.mxu0 %v576_v35  ;;  %v582_v39 = vld [vmem:[#allocation3 + $0xf0] ss:$8 sps:$4 sm:$0xff]   ;;  %vm157_vm1 = vcmask 130048   ;;  %v68_v42 = vshrl.u32 %v67_v41, 7 }
  0x33   :  { %162 = vmatpush1.bf16.msra.mxu0 %v574_v37  ;;  %v144_v40 = vld [vmem:[%s747_s1] sm:$0xf]  ;;  %vm473_vm2 = vcmask 7168  }
  0x34   :  { %v69_v43 = vsub.s32 0, %v68_v42  ;;  %v65_v44 = vld [vmem:[%s749_s3] sm:$0x3]  ;;  %v73_v45 = vsub.s32 1, %v68_v42 }
  0x35   :  { %403 = vmatpush1.bf16.msra.mxu1 %v543_v13  ;;  %v437_v62 = vld [vmem:[#allocation5] sm:$0x3] }
  0x36   :  { %404 = vmatprep.subr.bf16.mxu1 %v544_v14  ;;  %488 = vmatmul.mubr.msk.bf16.vlgmr.msra.gmra.mrb[4].mxu0 %vm157_vm1, %v144_v40  ;;  %v70_v46 = vrot.slane %v65_v44, %v69_v43  ;;  %v74_v47 = vrot.slane %v65_v44, %v73_v45  ;;  %v442_v63 = vrot.slane %v437_v62, %v69_v43  ;;  %v453_v2 = vld [vmem:[%s753_s7] sm:$0x3] }
  0x37   :  { %v446_v1 = vrot.slane %v437_v62, %v73_v45  ;;  %v458_v9 = vrot.slane %v453_v2, %v69_v43  ;;  %v462_v11 = vrot.slane %v453_v2, %v73_v45 }
  0x39   :  { %405 = vmatpush1.bf16.msra.mxu1 %v546_v15 }
  0x3a   :  { %406 = vmatprep.subr.bf16.mxu1 %v547_v16 }
  0x3d   :  { %407 = vmatpush1.bf16.msra.mxu1 %v549_v17  ;;  %v471_v17 = vstv %s754_s8 }
  0x3e   :  { %408 = vmatprep.subr.bf16.mxu1 %v550_v18 }
  0x41   :  { %409 = vmatpush1.bf16.msra.mxu1 %v552_v19 }
  0x42   :  { %410 = vmatprep.subr.bf16.mxu1 %v553_v20 }
  0x45   :  { %411 = vmatpush1.bf16.msra.mxu1 %v555_v21 }
  0x46   :  { %412 = vmatprep.subr.bf16.mxu1 %v556_v22 }
  0x49   :  { %413 = vmatpush1.bf16.msra.mxu1 %v558_v23 }
  0x4a   :  { %414 = vmatprep.subr.bf16.mxu1 %v559_v24 }
  0x4d   :  { %415 = vmatpush1.bf16.msra.mxu1 %v561_v25 }
  0x4e   :  { %416 = vmatprep.subr.bf16.mxu1 %v562_v26 }
  0x51   :  { %417 = vmatpush1.bf16.msra.mxu1 %v564_v27 }
  0x52   :  { %418 = vmatprep.subr.bf16.mxu1 %v565_v28 }
  0x55   :  { %419 = vmatpush1.bf16.msra.mxu1 %v567_v29 }
  0x56   :  { %420 = vmatprep.subr.bf16.mxu1 %v568_v30 }
  0x59   :  { %421 = vmatpush1.bf16.msra.mxu1 %v570_v31 }
  0x5a   :  { %422 = vmatprep.subr.bf16.mxu1 %v571_v32 }
  0x5d   :  { %423 = vmatpush1.bf16.msra.mxu1 %v573_v33 }
  0x5e   :  { %424 = vmatprep.subr.bf16.mxu1 %v577_v34 }
  0x61   :  { %425 = vmatpush1.bf16.msra.mxu1 %v579_v36 }
  0x62   :  { %426 = vmatprep.subr.bf16.mxu1 %v580_v38 }
  0x65   :  { %427 = vmatpush1.bf16.msra.mxu1 %v582_v39 }
 0x101   :  { %v135_v48 = vpop.f32.mrb[0].mxu0 }
 0x102   :  { %v136_v49 = vadd.f32 %v135_v48, %v70_v46  ;;  %v137_v50 = vpop.f32.mrb[1].mxu0 }
 0x103   :  { %v138_v51 = vadd.f32 %v137_v50, %v74_v47  ;;  %v139_v52 = vpop.f32.mrb[2].mxu0 }
 0x104   :  { %v142_v53 = vmax.f32 %v136_v49, 0.0  ;;  %v140_v54 = vpop.f32.mrb[3].mxu0 }
 0x105   :  { %v143_v55 = vmax.f32 %v138_v51, 0.0 }
 0x106   :  { %v202_v57 = vpack.c.bf16 %v142_v53, %v142_v53 }
 0x107   :  { %v203_v56 = vpack.c.bf16 %v143_v55, %v143_v55 }
 0x109   :  { %428 = vmatprep.mubr.bf16.mxu1 %v203_v56  ;;  %v195_v58 = vpop.f32.mrb[4].mxu0 }
 0x10a   :  { %429 = vmatmul.mubr.bf16.vlgmr.msra.gmra.mrb[0].mxu1 %v202_v57  ;;  %v197_v59 = vpop.f32.mrb[5].mxu0 }
 0x10b   :  { %v199_v60 = vpop.f32.mrb[6].mxu0 }
 0x10c   :  { %v200_v61 = vpop.f32.mrb[7].mxu0 }
 0x1dd   :  { %v430_v0 = vpop.f32.mrb[0].mxu1 }
 0x1de   :  { %v431_v3 = vadd.f32 %v430_v0, %v195_v58  ;;  %v432_v4 = vpop.f32.mrb[1].mxu1 }
 0x1df   :  { %v433_v5 = vadd.f32 %v432_v4, %v197_v59  ;;  %v434_v6 = vpop.f32.mrb[2].mxu1 }
 0x1e0   :  { %v449_v7 = vadd.f32 %v442_v63, %v431_v3  ;;  %v435_v8 = vpop.f32.mrb[3].mxu1 }
 0x1e1   :  { %v450_v10 = vadd.f32 %v446_v1, %v433_v5 }
 0x1e2   :  { %v451_v12 = vmax.f32 %v449_v7, 0.0 }
 0x1e3   :  { %v452_v13 = vmax.f32 %v450_v10, 0.0 }
 0x1e4   :  { %v465_v14 = vmul.f32 %v458_v9, %v451_v12 }
 0x1e5   :  { %v466_v15 = vmul.f32 %v462_v11, %v452_v13 }
 0x1e7   :  { %v467_v16 = vadd.f32 %v466_v15, %v465_v14 }
 0x1e9   :  { %468 = vadd.xlane.f32.xlu0 %v467_v16 }
 0x276   :  { %v469_v18 = vpop.xlane.xlu0 %468 }
 0x277   :  { %v472_v19 = vadd.f32 %v471_v17, %v469_v18 }
 0x279   :  { %474 = vst.msk [vmem:[%s755_s9] sm:$0xff] %vm473_vm2, %v472_v19 }
 0x27a   :  { %479 = vsyncpa [#allocation4], 1 }
 0x27b   :  { %480 = vsyncpa [#allocation6], 1 }

</bundles_post_ra>
